<compile_context>
chip_gen: v7x
topology: tpu7x:2x2x1
jax: 0.10.0
libtpu: 0.0.40
codegen_flags: <defaults>
</compile_context>

<pallas_src>
import functools

import jax
import jax.numpy as jnp
from jax.experimental import pallas as pl
from jax.experimental.pallas import tpu as pltpu

BN_EPS = 1e-5
LEAKY_SLOPE = 0.01
LANE = 128


def _round_up(n, m):
    return ((n + m - 1) // m) * m


def _pad_rows(a, rows):
    pad = rows - a.shape[0]
    return a if pad == 0 else jnp.pad(a, ((0, pad), (0, 0)))


# --------------------------------------------------------------------------- #
# Parameter preparation (done once, off the per-call path)
# --------------------------------------------------------------------------- #
def make_params(key, input_dim, hidden_dim, aux_dim):
    """Deterministic synthetic parameters (shapes match the PyTorch module)."""
    k1, k2, k3, k4, k5, k6 = jax.random.split(key, 6)
    in1 = input_dim + aux_dim
    return {
        "w1": jax.random.normal(k1, (hidden_dim, in1), jnp.float32) * 0.1,
        "b1": jax.random.normal(k2, (hidden_dim,), jnp.float32) * 0.1,
        "gamma": 1.0 + 0.1 * jax.random.normal(k3, (hidden_dim,), jnp.float32),
        "beta": 0.1 * jax.random.normal(k4, (hidden_dim,), jnp.float32),
        "w2": jax.random.normal(k5, (input_dim, hidden_dim), jnp.float32) * 0.1,
        "b2": jax.random.normal(k6, (input_dim,), jnp.float32) * 0.1,
    }


def prepare_params(params, input_dim, hidden_dim, aux_dim):
    """Transpose / pad / pack parameters once into a kernel-ready layout."""
    hpad = _round_up(hidden_dim, LANE)
    vpad = max(hpad, _round_up(input_dim, LANE))

    w1 = params["w1"].astype(jnp.float32)          # (hidden, input+aux)
    w1x = jnp.zeros((input_dim, hpad), jnp.float32)
    w1x = w1x.at[:, :hidden_dim].set(w1[:, :input_dim].T)
    w1a = jnp.zeros((aux_dim, hpad), jnp.float32)
    w1a = w1a.at[:, :hidden_dim].set(w1[:, input_dim:].T)

    # w2 padded only on the contraction dim; output stays input_dim lanes wide so the
    # kernel stores a narrow output (no 8x-inflated HBM writes, no wrapper lane-slice).
    w2 = jnp.zeros((hpad, input_dim), jnp.float32)
    w2 = w2.at[:hidden_dim, :].set(params["w2"].astype(jnp.float32).T)

    # Packed per-feature vectors: row 0=b1, 1=gamma, 2=beta, 3=b2 (zero-padded).
    vec = jnp.zeros((8, vpad), jnp.float32)
    vec = vec.at[0, :hidden_dim].set(params["b1"])
    vec = vec.at[1, :hidden_dim].set(params["gamma"])
    vec = vec.at[2, :hidden_dim].set(params["beta"])
    vec = vec.at[3, :input_dim].set(params["b2"])

    return {
        "w1x": w1x, "w1a": w1a, "w2": w2, "vec": vec,
        "input_dim": input_dim, "hidden_dim": hidden_dim, "aux_dim": aux_dim,
        "hpad": hpad, "vpad": vpad,
    }


# --------------------------------------------------------------------------- #
# Kernels
# --------------------------------------------------------------------------- #
def _fused_kernel(x_ref, aux_ref, w1x_ref, w1a_ref, vec_ref, w2_ref, o_ref,
                  *, batch, hpad, input_dim):
    """Whole batch in one block: Linear1 + BN + LeakyReLU + Linear2 + tanh."""
    b1 = vec_ref[0:1, :hpad]
    gamma = vec_ref[1:2, :hpad]
    beta = vec_ref[2:3, :hpad]
    b2 = vec_ref[3:4, :input_dim]

    h = (jnp.dot(x_ref[...], w1x_ref[...], preferred_element_type=jnp.float32)
         + jnp.dot(aux_ref[...], w1a_ref[...], preferred_element_type=jnp.float32)
         + b1)

    # Batch-dim mask so zero-padded rows never contaminate BN statistics.
    rows = jax.lax.broadcasted_iota(jnp.int32, h.shape, 0)
    mask = rows < batch
    inv_b = 1.0 / float(batch)
    hm = jnp.where(mask, h, 0.0)
    mean = jnp.sum(hm, axis=0, keepdims=True) * inv_b
    centered = h - mean
    var = jnp.sum(jnp.where(mask, centered * centered, 0.0),
                  axis=0, keepdims=True) * inv_b

    hn = centered * jax.lax.rsqrt(var + BN_EPS) * gamma + beta
    hn = jnp.where(hn > 0, hn, LEAKY_SLOPE * hn)

    out = jnp.dot(hn, w2_ref[...], preferred_element_type=jnp.float32) + b2
    o_ref[...] = jnp.tanh(out).astype(o_ref.dtype)


def _stats_kernel(x_ref, aux_ref, w1x_ref, w1a_ref, vec_ref, stats_ref,
                  *, batch, b_tile, tiles_per_core, n_tiles, hpad):
    """Pass 1: per-core partial (sum, sum-of-squares) of the Linear1 output.

    Grid is (2, tiles_per_core): the first ("parallel") axis splits the tiles across
    TensorCores on v7x; each core accumulates into its own resident (8, hpad) slab.
    """
    c = pl.program_id(0)
    j = pl.program_id(1)
    t = c * tiles_per_core + j                   # logical tile (may be a phantom)
    t_data = jnp.minimum(t, n_tiles - 1)         # tile whose data is actually in the block

    @pl.when(j == 0)
    def _():
        stats_ref[...] = jnp.zeros_like(stats_ref)

    b1 = vec_ref[0:1, :hpad]
    h = (jnp.dot(x_ref[...], w1x_ref[...], preferred_element_type=jnp.float32)
         + jnp.dot(aux_ref[...], w1a_ref[...], preferred_element_type=jnp.float32)
         + b1)

    # Mask out-of-batch rows of the ragged last tile AND the whole phantom tile
    # (when n_tiles is odd, the second core's final step re-maps to the last real tile).
    rows = t_data * b_tile + jax.lax.broadcasted_iota(jnp.int32, h.shape, 0)
    valid = (rows < batch) & (t < n_tiles)
    hm = jnp.where(valid, h, 0.0)

    upd = jnp.concatenate(
        [jnp.sum(hm, axis=0, keepdims=True),
         jnp.sum(hm * hm, axis=0, keepdims=True)], axis=0)        # (2, hpad)
    stats_ref[0:2, :] = stats_ref[0:2, :] + upd                   # single RMW per step


def _apply_kernel(x_ref, aux_ref, w1x_ref, w1a_ref, vec_ref, w2_ref, stats_ref,
                  o_ref, *, batch, hpad, input_dim):
    """Pass 2: recompute Linear1, normalize with full-batch stats, finish layers."""
    b1 = vec_ref[0:1, :hpad]
    gamma = vec_ref[1:2, :hpad]
    beta = vec_ref[2:3, :hpad]
    b2 = vec_ref[3:4, :input_dim]

    h = (jnp.dot(x_ref[...], w1x_ref[...], preferred_element_type=jnp.float32)
         + jnp.dot(aux_ref[...], w1a_ref[...], preferred_element_type=jnp.float32)
         + b1)

    inv_b = 1.0 / float(batch)
    # Combine the two per-core partial stats (core 0: rows 0/1, core 1: rows 8/9).
    ssum = stats_ref[0:1, :] + stats_ref[8:9, :]
    ssq = stats_ref[1:2, :] + stats_ref[9:10, :]
    mean = ssum * inv_b
    # TODO(synk): E[h^2]-mean^2 loses a few ulps vs. the centered form when |mean|>>std;
    #             acceptable at the 5e-5 tolerance used for this path.
    var = jnp.maximum(ssq * inv_b - mean * mean, 0.0)

    hn = (h - mean) * jax.lax.rsqrt(var + BN_EPS) * gamma + beta
    hn = jnp.where(hn > 0, hn, LEAKY_SLOPE * hn)

    out = jnp.dot(hn, w2_ref[...], preferred_element_type=jnp.float32) + b2
    o_ref[...] = jnp.tanh(out).astype(o_ref.dtype)


# --------------------------------------------------------------------------- #
# Wrapper
# --------------------------------------------------------------------------- #
def diffusion_forward(x, aux, prepared, *, max_fused_batch=2048, block_batch=4096):
    """x: (B, input_dim), aux: (B, aux_dim)  -> (B, input_dim) float32."""
    if x.ndim == 1:
        x = x[None, :]
    if aux.ndim == 1:
        aux = aux[None, :]

    input_dim = prepared["input_dim"]
    aux_dim = prepared["aux_dim"]
    hpad = prepared["hpad"]
    w1x, w1a, w2, vec = (prepared["w1x"], prepared["w1a"],
                         prepared["w2"], prepared["vec"])

    B = x.shape[0]
    x = x.astype(jnp.float32)
    aux = aux.astype(jnp.float32)

    def full(a):
        return pl.BlockSpec(a.shape, lambda *idx: (0,) * a.ndim)

    # TODO(synk): batch size is baked into the compiled kernel (exact shapes + partial);
    #             bucket B / pass it via scalar-prefetch if it varies a lot in serving.

    bpad8 = _round_up(B, 8)
    if bpad8 <= max_fused_batch:
        # ---------- small batch: single fused block (BN reduction in-kernel) ----------
        xp = _pad_rows(x, bpad8)
        auxp = _pad_rows(aux, bpad8)
        kernel = functools.partial(_fused_kernel, batch=B, hpad=hpad,
                                   input_dim=input_dim)
        out = pl.pallas_call(
            kernel,
            out_shape=jax.ShapeDtypeStruct((bpad8, input_dim), jnp.float32),
            in_specs=[full(xp), full(auxp), full(w1x), full(w1a), full(vec), full(w2)],
            out_specs=pl.BlockSpec((bpad8, input_dim), lambda *idx: (0, 0)),
        )(xp, auxp, w1x, w1a, vec, w2)
        return out if bpad8 == B else out[:B]

    # ---------- large batch: two-pass, batch-tiled, pipelined, no input padding ----------
    b_tile = _round_up(max(8, min(block_batch, B)), 8)
    n_tiles = -(-B // b_tile)
    tiles_per_core = -(-n_tiles // 2)     # v7x: split the stats pass across both TCs

    def tile_map(c, j):
        return (jnp.minimum(c * tiles_per_core + j, n_tiles - 1), 0)

    # Pass 1: full-batch BN statistics, partial per core, resident (8, hpad) accumulators.
    stats_kernel = functools.partial(
        _stats_kernel, batch=B, b_tile=b_tile,
        tiles_per_core=tiles_per_core, n_tiles=n_tiles, hpad=hpad)
    stats = pl.pallas_call(
        stats_kernel,
        out_shape=jax.ShapeDtypeStruct((16, hpad), jnp.float32),
        grid=(2, tiles_per_core),
        in_specs=[
            pl.BlockSpec((b_tile, input_dim), tile_map),
            pl.BlockSpec((b_tile, aux_dim), tile_map),
            pl.BlockSpec(w1x.shape, lambda c, j: (0, 0)),
            pl.BlockSpec(w1a.shape, lambda c, j: (0, 0)),
            pl.BlockSpec(vec.shape, lambda c, j: (0, 0)),
        ],
        out_specs=pl.BlockSpec((8, hpad), lambda c, j: (c, 0)),
        compiler_params=pltpu.CompilerParams(
            dimension_semantics=("parallel", "arbitrary")),
    )(x, aux, w1x, w1a, vec)

    # Pass 2: normalize + LeakyReLU + Linear2 + tanh, batch-parallel; narrow output,
    # exactly (B, input_dim) -- ragged last tile handled by Pallas boundary blocks.
    apply_kernel = functools.partial(
        _apply_kernel, batch=B, hpad=hpad, input_dim=input_dim)
    out = pl.pallas_call(
        apply_kernel,
        out_shape=jax.ShapeDtypeStruct((B, input_dim), jnp.float32),
        grid=(n_tiles,),
        in_specs=[
            pl.BlockSpec((b_tile, input_dim), lambda i: (i, 0)),
            pl.BlockSpec((b_tile, aux_dim), lambda i: (i, 0)),
            pl.BlockSpec(w1x.shape, lambda i: (0, 0)),
            pl.BlockSpec(w1a.shape, lambda i: (0, 0)),
            pl.BlockSpec(vec.shape, lambda i: (0, 0)),
            pl.BlockSpec(w2.shape, lambda i: (0, 0)),
            pl.BlockSpec(stats.shape, lambda i: (0, 0)),
        ],
        out_specs=pl.BlockSpec((b_tile, input_dim), lambda i: (i, 0)),
        compiler_params=pltpu.CompilerParams(dimension_semantics=("parallel",)),
    )(x, aux, w1x, w1a, vec, w2, stats)
    return out


# --------------------------------------------------------------------------- #
# Reference + self-check
# --------------------------------------------------------------------------- #
def _reference(x, aux, params):
    xc = jnp.concatenate([x, aux], axis=1)
    h = xc @ params["w1"].T + params["b1"]
    mean = jnp.mean(h, axis=0, keepdims=True)
    var = jnp.mean((h - mean) ** 2, axis=0, keepdims=True)
    h = (h - mean) / jnp.sqrt(var + BN_EPS) * params["gamma"] + params["beta"]
    h = jnp.where(h > 0, h, LEAKY_SLOPE * h)
    return jnp.tanh(h @ params["w2"].T + params["b2"])


if __name__ == "__main__":
    INPUT_DIM, HIDDEN_DIM, AUX_DIM = 16, 32, 16

    key = jax.random.PRNGKey(0)
    kp, kx1, ka1, kx2, ka2 = jax.random.split(key, 5)
    params = make_params(kp, INPUT_DIM, HIDDEN_DIM, AUX_DIM)
    prepared = prepare_params(params, INPUT_DIM, HIDDEN_DIM, AUX_DIM)

    # Small batch -> fused single-block path.
    B1 = 8
    x1 = jax.random.normal(kx1, (B1, INPUT_DIM), jnp.float32)
    aux1 = jax.random.normal(ka1, (B1, AUX_DIM), jnp.float32)
    out1 = jax.block_until_ready(diffusion_forward(x1, aux1, prepared))
    ref1 = _reference(x1, aux1, params)
    assert out1.shape == (B1, INPUT_DIM)
    assert jnp.allclose(out1, ref1, atol=1e-5, rtol=1e-5), "fused path mismatch"

    # Larger, non-tile-multiple batch -> forced two-pass tiled path (dual-core stats
    # split with a phantom tile, ragged last tile, full-batch BN stats via row masking).
    B2 = 600
    x2 = jax.random.normal(kx2, (B2, INPUT_DIM), jnp.float32)
    aux2 = jax.random.normal(ka2, (B2, AUX_DIM), jnp.float32)
    out2 = jax.block_until_ready(
        diffusion_forward(x2, aux2, prepared, max_fused_batch=0, block_batch=256))
    ref2 = _reference(x2, aux2, params)
    assert out2.shape == (B2, INPUT_DIM)
    assert jnp.allclose(out2, ref2, atol=5e-5, rtol=5e-5), "tiled path mismatch"

    print("KERNEL_OK")
</pallas_src>

<mosaic_0001>
module attributes {stable_mosaic.version = 11 : i64} {
  func.func @_fused_kernel(%arg0: memref<8x16xf32, #tpu.memory_space<vmem>>, %arg1: memref<8x16xf32, #tpu.memory_space<vmem>>, %arg2: memref<16x128xf32, #tpu.memory_space<vmem>>, %arg3: memref<16x128xf32, #tpu.memory_space<vmem>>, %arg4: memref<8x128xf32, #tpu.memory_space<vmem>>, %arg5: memref<128x16xf32, #tpu.memory_space<vmem>>, %arg6: memref<8x16xf32, #tpu.memory_space<vmem>>) attributes {dimension_semantics = [], scalar_prefetch = 0 : i64, scratch_operands = 0 : i64, tpu.core_type = #tpu.core_type<tc>} {
    %c0 = arith.constant 0 : index
    %c0_0 = arith.constant 0 : index
    %0 = vector.load %arg4[%c0, %c0_0] : memref<8x128xf32, #tpu.memory_space<vmem>>, vector<1x128xf32>
    %c1 = arith.constant 1 : index
    %c0_1 = arith.constant 0 : index
    %1 = vector.load %arg4[%c1, %c0_1] : memref<8x128xf32, #tpu.memory_space<vmem>>, vector<1x128xf32>
    %c2 = arith.constant 2 : index
    %c0_2 = arith.constant 0 : index
    %2 = vector.load %arg4[%c2, %c0_2] : memref<8x128xf32, #tpu.memory_space<vmem>>, vector<1x128xf32>
    %c3 = arith.constant 3 : index
    %c0_3 = arith.constant 0 : index
    %3 = vector.load %arg4[%c3, %c0_3] : memref<8x128xf32, #tpu.memory_space<vmem>>, vector<1x16xf32>
    %c0_4 = arith.constant 0 : index
    %c0_5 = arith.constant 0 : index
    %4 = vector.load %arg0[%c0_4, %c0_5] : memref<8x16xf32, #tpu.memory_space<vmem>>, vector<8x16xf32>
    %c0_6 = arith.constant 0 : index
    %c0_7 = arith.constant 0 : index
    %5 = vector.load %arg2[%c0_6, %c0_7] : memref<16x128xf32, #tpu.memory_space<vmem>>, vector<16x128xf32>
    %cst = arith.constant dense<0.000000e+00> : vector<8x128xf32>
    %6 = tpu.matmul %4, %5, %cst {dimension_numbers = #tpu.dot_dimension_numbers<[1], [0], [0], [1], [0, 0, 1, 1], [], []>} : vector<8x16xf32>, vector<16x128xf32>, vector<8x128xf32> -> vector<8x128xf32>
    %c0_8 = arith.constant 0 : index
    %c0_9 = arith.constant 0 : index
    %7 = vector.load %arg1[%c0_8, %c0_9] : memref<8x16xf32, #tpu.memory_space<vmem>>, vector<8x16xf32>
    %c0_10 = arith.constant 0 : index
    %c0_11 = arith.constant 0 : index
    %8 = vector.load %arg3[%c0_10, %c0_11] : memref<16x128xf32, #tpu.memory_space<vmem>>, vector<16x128xf32>
    %cst_12 = arith.constant dense<0.000000e+00> : vector<8x128xf32>
    %9 = tpu.matmul %7, %8, %cst_12 {dimension_numbers = #tpu.dot_dimension_numbers<[1], [0], [0], [1], [0, 0, 1, 1], [], []>} : vector<8x16xf32>, vector<16x128xf32>, vector<8x128xf32> -> vector<8x128xf32>
    %10 = arith.addf %6, %9 : vector<8x128xf32>
    %11 = vector.broadcast %0 : vector<1x128xf32> to vector<8x128xf32>
    %12 = arith.addf %10, %11 : vector<8x128xf32>
    %13 = tpu.iota {dimensions = array<i32: 0>} : vector<8x128xi32>
    %c8_i32 = arith.constant 8 : i32
    %14 = vector.broadcast %c8_i32 : i32 to vector<8x128xi32>
    %15 = arith.cmpi slt, %13, %14 : vector<8x128xi32>
    %cst_13 = arith.constant 0.000000e+00 : f32
    %16 = vector.broadcast %cst_13 : f32 to vector<8x128xf32>
    %17 = arith.select %15, %12, %16 : vector<8x128xi1>, vector<8x128xf32>
    %cst_14 = arith.constant dense<0.000000e+00> : vector<128xf32>
    %18 = vector.multi_reduction <add>, %17, %cst_14 [0] : vector<8x128xf32> to vector<128xf32>
    %19 = vector.shape_cast %18 : vector<128xf32> to vector<1x128xf32>
    %cst_15 = arith.constant 1.250000e-01 : f32
    %20 = vector.broadcast %cst_15 : f32 to vector<1x128xf32>
    %21 = arith.mulf %19, %20 : vector<1x128xf32>
    %22 = vector.broadcast %21 : vector<1x128xf32> to vector<8x128xf32>
    %23 = arith.subf %12, %22 : vector<8x128xf32>
    %24 = arith.mulf %23, %23 : vector<8x128xf32>
    %cst_16 = arith.constant 0.000000e+00 : f32
    %25 = vector.broadcast %cst_16 : f32 to vector<8x128xf32>
    %26 = arith.select %15, %24, %25 : vector<8x128xi1>, vector<8x128xf32>
    %cst_17 = arith.constant dense<0.000000e+00> : vector<128xf32>
    %27 = vector.multi_reduction <add>, %26, %cst_17 [0] : vector<8x128xf32> to vector<128xf32>
    %28 = vector.shape_cast %27 : vector<128xf32> to vector<1x128xf32>
    %cst_18 = arith.constant 1.250000e-01 : f32
    %29 = vector.broadcast %cst_18 : f32 to vector<1x128xf32>
    %30 = arith.mulf %28, %29 : vector<1x128xf32>
    %cst_19 = arith.constant 9.99999974E-6 : f32
    %31 = vector.broadcast %cst_19 : f32 to vector<1x128xf32>
    %32 = arith.addf %30, %31 : vector<1x128xf32>
    %33 = math.rsqrt %32 : vector<1x128xf32>
    %34 = vector.broadcast %33 : vector<1x128xf32> to vector<8x128xf32>
    %35 = arith.mulf %23, %34 : vector<8x128xf32>
    %36 = vector.broadcast %1 : vector<1x128xf32> to vector<8x128xf32>
    %37 = arith.mulf %35, %36 : vector<8x128xf32>
    %38 = vector.broadcast %2 : vector<1x128xf32> to vector<8x128xf32>
    %39 = arith.addf %37, %38 : vector<8x128xf32>
    %cst_20 = arith.constant 0.000000e+00 : f32
    %40 = vector.broadcast %cst_20 : f32 to vector<8x128xf32>
    %41 = arith.cmpf ogt, %39, %40 : vector<8x128xf32>
    %cst_21 = arith.constant 0.00999999977 : f32
    %42 = vector.broadcast %cst_21 : f32 to vector<8x128xf32>
    %43 = arith.mulf %42, %39 : vector<8x128xf32>
    %44 = arith.select %41, %39, %43 : vector<8x128xi1>, vector<8x128xf32>
    %c0_22 = arith.constant 0 : index
    %c0_23 = arith.constant 0 : index
    %45 = vector.load %arg5[%c0_22, %c0_23] : memref<128x16xf32, #tpu.memory_space<vmem>>, vector<128x16xf32>
    %cst_24 = arith.constant dense<0.000000e+00> : vector<8x16xf32>
    %46 = tpu.matmul %44, %45, %cst_24 {dimension_numbers = #tpu.dot_dimension_numbers<[1], [0], [0], [1], [0, 0, 1, 1], [], []>} : vector<8x128xf32>, vector<128x16xf32>, vector<8x16xf32> -> vector<8x16xf32>
    %47 = vector.broadcast %3 : vector<1x16xf32> to vector<8x16xf32>
    %48 = arith.addf %46, %47 : vector<8x16xf32>
    %49 = math.tanh %48 : vector<8x16xf32>
    %c0_25 = arith.constant 0 : index
    %c0_26 = arith.constant 0 : index
    %50 = vector.load %arg6[%c0_25, %c0_26] : memref<8x16xf32, #tpu.memory_space<vmem>>, vector<8x16xf32>
    tpu.vector_store %arg6[%c0_25, %c0_26], %49 {strides = array<i32>} : memref<8x16xf32, #tpu.memory_space<vmem>>, vector<8x16xf32>,
    return
  }
}

</mosaic_0001>

<bundles_post_ra>
// kernel: tpu_custom_call.1
= control target key start
LH: loop header
LB: loop body
LE: loop exit
PB: predicated region body
PF: predicated region fallthrough
CT: control target
= control target key end

     0   :  { %v469_v2 = vmov 0.0|0.0   ;;  %vm470_vm0 = vmmov 0   ;;  %v471_v4 = vmov 0.0   ;;  %s601_s0 = inlined_call_operand.vmem [shape: f32[8,16], index: 0, kind: input, shape index: {}]   ;;  %s602_s1 = inlined_call_operand.vmem [shape: f32[8,16], index: 1, kind: input, shape index: {}]   ;;  %s603_s2 = inlined_call_operand.vmem [shape: f32[16,128], index: 2, kind: input, shape index: {}]   ;;  %s604_s3 = inlined_call_operand.vmem [shape: f32[16,128], index: 3, kind: input, shape index: {}]   ;;  %s605_s4 = inlined_call_operand.vmem [shape: f32[8,128], index: 4, kind: input, shape index: {}]   ;;  %s606_s5 = inlined_call_operand.vmem [shape: f32[128,16], index: 5, kind: input, shape index: {}]   ;;  %s607_s6 = inlined_call_operand.hbm [shape: f32[8,16], index: 6, kind: output, shape index: {}]  }
   0x1   :  { %v32_v0 = vld [vmem:[%s604_s3] sm:$0xff]  ;;  %v33_v1 = vld [vmem:[%s604_s3 + $0x8] sm:$0xff]  ;;  %407 = vmatprep.subr.bf16.mxu1 %v469_v2  ;;  %362 = vmatprep.mubr.msk.f32.mxu1 %vm470_vm0, %v471_v4 }
   0x2   :  { %v408_v3 = vpack.c.bf16 %v33_v1, %v32_v0  ;;  %v29_v5 = vld [vmem:[%s603_s2] sm:$0xff]  ;;  %v30_v6 = vld [vmem:[%s603_s2 + $0x8] sm:$0xff]  ;;  %413 = vmatprep.subr.bf16.mxu0 %v469_v2  ;;  %404 = vmatprep.mubr.msk.f32.mxu0 %vm470_vm0, %v471_v4 }
   0x3   :  { %11 = vsyncpa [#allocation3], 0  ;;  %v31_v7 = vld [vmem:[%s602_s1] sm:$0xff]  ;;  %vm34_vm1 = vcmask 130048   ;;  %v411_v8 = vpack.c.bf16 %v30_v6, %v29_v5  ;;  %v224_v11 = vld [vmem:[%s606_s5 + $0x8] sm:$0xff]  ;;  %s472_s16 = smov [#allocation2]  }
   0x4   :  { %409 = vmatpush3.bf16.msra.mxu1 %v408_v3  ;;  %v28_v9 = vld [vmem:[%s601_s0] sm:$0xff]  ;;  %v225_v13 = vld [vmem:[%s606_s5 + $0x10] sm:$0xff]  ;;  %v226_v14 = vld [vmem:[%s606_s5 + $0x18] sm:$0xff]  ;;  %s321_s17 = sshll.u32 %s472_s16, 4  ;;  %s322_s17 = int_to_ptr.vmem [resolvable:$true] %s321_s17 }
   0x5   :  { %410 = vmatprep.subr.bf16.mxu1 %v469_v2  ;;  %v223_v10 = vld [vmem:[%s606_s5] sm:$0xff]  ;;  %v417_v15 = vpack.c.bf16 %v226_v14, %v225_v13  ;;  %v228_v17 = vld [vmem:[%s606_s5 + $0x28] sm:$0xff]  ;;  %v229_v19 = vld [vmem:[%s606_s5 + $0x30] sm:$0xff]  ;;  %s445_s18 = scalar_lea.vmem %s322_s17, 128  ;;  %p450_p1 = scmp.lt.s32.totalorder %s322_s17, %s322_s17 }
   0x6   :  { %v414_v12 = vpack.c.bf16 %v224_v11, %v223_v10  ;;  %v227_v16 = vld [vmem:[%s606_s5 + $0x20] sm:$0xff]  ;;  %v230_v20 = vld [vmem:[%s606_s5 + $0x38] sm:$0xff]  ;;  %v232_v23 = vld [vmem:[%s606_s5 + $0x48] sm:$0xff]  ;;  %p446_p0 = scmp.ne.s32.totalorder %s322_s17, %s445_s18  ;;  %p451_p2 = scmp.lt.s32.totalorder %s445_s18, %s445_s18 }
   0x7   :  { %363 = vmatmul.mubr.msk.f32.vlgmr.msra.gmra.mrb[0].mxu1 %vm34_vm1, %v31_v7  ;;  %v420_v18 = vpack.c.bf16 %v228_v17, %v227_v16  ;;  %v423_v21 = vpack.c.bf16 %v230_v20, %v229_v19  ;;  %v231_v22 = vld [vmem:[%s606_s5 + $0x40] sm:$0xff]  ;;  %v233_v25 = vld [vmem:[%s606_s5 + $0x50] sm:$0xff]  ;;  %v234_v26 = vld [vmem:[%s606_s5 + $0x58] sm:$0xff] }
   0x8   :  { %412 = vmatpush3.bf16.msra.mxu1 %v411_v8  ;;  %369 = vmatprep.mubr.msk.f32.mxu1 %vm470_vm0, %v471_v4  ;;  %v426_v24 = vpack.c.bf16 %v232_v23, %v231_v22  ;;  %v429_v27 = vpack.c.bf16 %v234_v26, %v233_v25  ;;  %v235_v28 = vld [vmem:[%s606_s5 + $0x60] sm:$0xff]  ;;  %v236_v29 = vld [vmem:[%s606_s5 + $0x68] sm:$0xff]  ;;  %v237_v31 = vld [vmem:[%s606_s5 + $0x70] sm:$0xff]  ;;  %p452_p3 = por %p451_p2, %p450_p1 }
   0x9   :  { %415 = vmatpush3.bf16.msra.mxu0 %v414_v12  ;;  %v432_v30 = vpack.c.bf16 %v236_v29, %v235_v28  ;;  %v238_v32 = vld [vmem:[%s606_s5 + $0x78] sm:$0xff]  ;;  %v331_v36 = vld [vmem:[%s605_s4] ss:$0 sm:$0xff]  ;;  %v332_v59 = vld [vmem:[%s605_s4 + $0x1] ss:$0 sm:$0xff] }
   0xa   :  { %416 = vmatprep.subr.bf16.mxu0 %v469_v2  ;;  %v435_v33 = vpack.c.bf16 %v238_v32, %v237_v31  ;;  %v333_v61 = vld [vmem:[%s605_s4 + $0x2] ss:$0 sm:$0xff]  ;;  %p453_p4 = pnand %p452_p3, %p446_p0 }
   0xb   :  { %370 = vmatmul.mubr.msk.f32.vlgmr.msra.gmra.mrb[2].mxu1 %vm34_vm1, %v28_v9 }
   0xd   :  { %418 = vmatpush3.bf16.msra.mxu0 %v417_v15 }
   0xe   :  { %419 = vmatprep.subr.bf16.mxu0 %v469_v2 }
  0x11   :  { %421 = vmatpush3.bf16.msra.mxu0 %v420_v18 }
  0x12   :  { %422 = vmatprep.subr.bf16.mxu0 %v469_v2 }
  0x15   :  { %424 = vmatpush3.bf16.msra.mxu0 %v423_v21 }
  0x16   :  { %425 = vmatprep.subr.bf16.mxu0 %v469_v2 }
  0x19   :  { %427 = vmatpush3.bf16.msra.mxu0 %v426_v24 }
  0x1a   :  { %428 = vmatprep.subr.bf16.mxu0 %v469_v2 }
  0x1d   :  { %430 = vmatpush3.bf16.msra.mxu0 %v429_v27 }
  0x1e   :  { %431 = vmatprep.subr.bf16.mxu0 %v469_v2 }
  0x21   :  { %433 = vmatpush3.bf16.msra.mxu0 %v432_v30 }
  0x22   :  { %434 = vmatprep.subr.bf16.mxu0 %v469_v2  ;;  %v334_v2 = vld [vmem:[%s605_s4 + $0x3] ss:$0 sm:$0xff] }
  0x25   :  { %436 = vmatpush3.bf16.msra.mxu0 %v435_v33 }
  0xda   :  { %v104_v34 = vpop.f32.mrb[0].mxu1 }
  0xdb   :  { %v364_v35 = vpop.f32.mrb[1].mxu1 }
  0xde   :  { %v177_v37 = vpop.f32.mrb[2].mxu1 }
  0xdf   :  { %v178_v38 = vadd.f32 %v177_v37, %v104_v34  ;;  %v371_v39 = vpop.f32.mrb[3].mxu1 }
  0xe1   :  { %v185_v40 = vadd.f32 %v331_v36, %v178_v38 }
  0xe3   :  { %v190_v41 = vrot.slane %v185_v40, 4 }
  0xe5   :  { %v191_v42 = vadd.f32 %v190_v41, %v185_v40 }
  0xe7   :  { %v192_v43 = vrot.slane %v191_v42, 2 }
  0xe9   :  { %v193_v44 = vadd.f32 %v192_v43, %v191_v42 }
  0xeb   :  { %v194_v45 = vrot.slane %v193_v44, 1 }
  0xed   :  { %v195_v46 = vadd.f32 %v194_v45, %v193_v44 }
  0xef   :  { %v196_v47 = vmul.f32 0.125, %v195_v46 }
  0xf1   :  { %v197_v48 = vsub.f32 %v185_v40, %v196_v47 }
  0xf3   :  { %v198_v49 = vmul.f32 %v197_v48, %v197_v48 }
  0xf5   :  { %v200_v50 = vrot.slane %v198_v49, 4 }
  0xf7   :  { %v201_v51 = vadd.f32 %v200_v50, %v198_v49 }
  0xf9   :  { %v202_v52 = vrot.slane %v201_v51, 2 }
  0xfb   :  { %v203_v53 = vadd.f32 %v202_v52, %v201_v51 }
  0xfd   :  { %v204_v54 = vrot.slane %v203_v53, 1 }
  0xff   :  { %v205_v55 = vadd.f32 %v204_v54, %v203_v53 }
 0x101   :  { %v206_v56 = vmul.f32 0.125, %v205_v55 }
 0x103   :  { %v207_v57 = vadd.f32 1e-05, %v206_v56 }
 0x105   :  { %441 = vrsqrt.f32 %v207_v57 }
 0x10f   :  { %v442_v58 = vpop.eup %441 }
 0x110   :  { %v209_v60 = vmul.f32 %v442_v58, %v197_v48 }
 0x112   :  { %v214_v62 = vmul.f32 %v332_v59, %v209_v60 }
 0x114   :  { %v219_v63 = vadd.f32 %v333_v61, %v214_v62 }
 0x116   :  { %vm220_vm2 = vcmp.gt.f32.partialorder %v219_v63, 0.0  ;;  %v221_v0 = vmul.f32 0.01, %v219_v63 }
 0x118   :  { %v222_v1 = vsel %vm220_vm2, %v219_v63, %v221_v0 }
 0x119   :  { %405 = vmatmul.mubr.f32.vlgmr.msra.gmra.mrb[0].mxu0 %v222_v1 }
 0x1ec   :  { %v309_v3 = vpop.f32.mrb[0].mxu0 }
 0x1ed   :  { %v310_v4 = vadd.f32 %v334_v2, %v309_v3  ;;  %v406_v5 = vpop.f32.mrb[1].mxu0 }
 0x1ef   :  { %443 = vtanh.f32 %v310_v4 }
 0x1f9   :  { %v444_v6 = vpop.eup %443 }
 0x1fa   :  { %314 = vst.msk [vmem:[#allocation2] sm:$0xff] %vm34_vm1, %v444_v6 }
 0x1fb   :  { %456 = shalt.err (!%p453_p4)
}
 0x1fc   :  { %s457_s4 = scalar_lea.hbm %s607_s6, 128 }
 0x1fd   :  { %p458_p5 = scmp.ne.s32.totalorder %s607_s6, %s457_s4  ;;  %p461_p6 = scmp.lt.u32.totalorder %s457_s4, %s607_s6 }
 0x1ff   :  { %p463_p7 = pnand %p461_p6, %p458_p5 }
 0x201   :  { %466 = shalt.err (!%p463_p7)
}
 0x202   :  { %324 = dma.vmem_to_hbm [thread:$0]  %s322_s17, 128, %s607_s6, [#allocation3]  }
 0x203   :  { %467 = dma.done.wait [#allocation3], 128  }
 0x204   :  { %468 = vsyncadd [#allocation3], 4294967168 }
 0x205   :  { %328 = vsyncpa [#allocation3], 1 }

</bundles_post_ra>
